<compile_context>
chip_gen: v6e
topology: v6e:2x2x1
jax: 0.10.0
libtpu: 0.0.40
codegen_flags: <defaults>
</compile_context>

<pallas_src>
import functools

import jax
import jax.numpy as jnp
from jax.experimental import pallas as pl
from jax.experimental.pallas import tpu as pltpu


def _round_up(x, m):
    return ((x + m - 1) // m) * m


def _conv2d_relu_kernel(x_ref, w_ref, b_ref, o_ref, *,
                        kh, kw, stride, dilation, wp, h_out, w_out,
                        n_mm, m_pad, block_n):
    # x_ref: (block_n, c_in_pad, l_pad)   flattened padded images (lane = spatial)
    # w_ref: (c_out, K = kh*kw*c_in_pad)  tap-major, channel-minor weights
    # b_ref: (c_out, 1)                   f32 bias
    # o_ref: (block_n, c_out, m_pad)      lane-dense NCHW-flat output (128-mult lanes)
    w2d = w_ref[...]
    st = stride
    c_out = w_ref.shape[0]
    m_out = h_out * w_out

    # ---- im2col slabs for the whole block, fused along the lane axis --------
    # Each tap is a full-sublane-group (c_in_pad, n_mm) lane-offset slice of the
    # flattened image; c_in was padded to the sublane packing in the wrapper so
    # the K-axis concat is sublane-aligned (no shuffles at part boundaries).
    cols = []
    for b in range(block_n):
        xb = x_ref[b]                                     # (c_in_pad, l_pad)
        parts = []
        for i in range(kh):
            for j in range(kw):
                d = (i * dilation) * wp + (j * dilation)
                parts.append(xb[:, d:d + n_mm])           # (c_in_pad, n_mm)
        cols.append(jnp.concatenate(parts, axis=0))       # (K, n_mm)
    slab = cols[0] if block_n == 1 else jnp.concatenate(cols, axis=1)

    # ---- ONE MXU matmul for the whole block of images ------------------------
    res = jnp.dot(w2d, slab, preferred_element_type=jnp.float32)  # (c_out, block_n*n_mm)

    # Bias + ReLU hoisted out of the per-image loop; f32 epilogue.
    res = jnp.maximum(res + b_ref[...], 0.0)

    # ---- per-image output compaction + lane-dense stores ---------------------
    #   out[:, r*w_out + c] = res[:, (r*st)*wp + c*st]
    for b in range(block_n):
        r = res[:, b * n_mm:(b + 1) * n_mm]
        r = r[:, :h_out * st * wp].reshape(c_out, h_out, st * wp)
        r = r[:, :, :w_out * st]
        if st > 1:
            # Output-side stride compaction (cheaper than input-side while
            # c_out is small relative to kh*kw*c_in).
            r = r.reshape(c_out, h_out, w_out, st)[..., 0]
        out = r.reshape(c_out, m_out)
        if m_pad != m_out:
            out = jnp.concatenate(
                [out, jnp.zeros((c_out, m_pad - m_out), out.dtype)], axis=1)
        o_ref[b] = out.astype(o_ref.dtype)


def conv2d_relu(x_nchw, w_oihw, bias, *, stride=1, padding=0, dilation=1,
                compute_dtype=jnp.float32):
    """PyTorch-semantics Conv2d(stride, padding, dilation) + ReLU via Pallas.

    Integer `padding` is applied symmetrically to H and W (PyTorch int padding).
    `compute_dtype=jnp.bfloat16` selects the bf16 MXU feed (v6e/v7x); the
    accumulation and bias/ReLU epilogue stay in f32 either way."""
    n, c_in, h, w = x_nchw.shape
    c_out, c_in_w, kh, kw = w_oihw.shape
    assert c_in == c_in_w

    hp, wp = h + 2 * padding, w + 2 * padding
    h_out = (hp - dilation * (kh - 1) - 1) // stride + 1
    w_out = (wp - dilation * (kw - 1) - 1) // stride + 1
    assert h_out > 0 and w_out > 0

    itemsize = jnp.dtype(compute_dtype).itemsize
    sub = 8 * (4 // itemsize)                 # sublane packing: 8 (f32) / 16 (bf16)
    c_in_pad = _round_up(c_in, sub)           # zero channels: free on the MXU

    m_out = h_out * w_out
    m_pad = _round_up(m_out, 128)             # lane-dense, unmasked output stores
    n_mm = _round_up(h_out * stride * wp, 128)
    max_d = dilation * (kh - 1) * wp + dilation * (kw - 1)
    l_pad = _round_up(max(hp * wp, max_d + n_mm), 128)

    # ---- cheap layout glue: NO transposes of x, output comes out NCHW-flat ---
    xp = x_nchw
    if padding:
        xp = jnp.pad(xp, ((0, 0), (0, 0), (padding, padding), (padding, padding)))
    x_flat = xp.reshape(n, c_in, hp * wp)
    x_flat = jnp.pad(x_flat, ((0, 0), (0, c_in_pad - c_in), (0, l_pad - hp * wp)))
    x_flat = x_flat.astype(compute_dtype)

    k_dim = kh * kw * c_in_pad
    # (o, ci, i, j) -> (o, i, j, ci_pad) -> (o, K): matches slab ordering.
    w_t = jnp.transpose(w_oihw, (0, 2, 3, 1))
    w_t = jnp.pad(w_t, ((0, 0), (0, 0), (0, 0), (0, c_in_pad - c_in)))
    w2d = w_t.reshape(c_out, k_dim).astype(compute_dtype)
    b2d = bias.reshape(c_out, 1).astype(jnp.float32)

    # ---- VMEM-budget-driven batch folding (amortize ~0.35us per-step cost) ---
    per_image_bytes = (2 * c_in_pad * l_pad * itemsize      # x block (double-buffered)
                       + k_dim * n_mm * itemsize            # im2col slab column
                       + c_out * n_mm * 4                   # f32 matmul result
                       + 2 * c_out * m_pad * 4)             # output block (double-buffered)
    budget = 4 << 20
    block_n = max(1, min(n, budget // max(per_image_bytes, 1)))
    block_n = min(block_n, 16)                # bound unrolled code / vreg pressure
    if n >= 2:
        # Keep grid length >= 2 so both v7x TensorCores get work (harmless on
        # single-TC v5e/v6e).
        block_n = min(block_n, -(-n // 2))
    n_pad = _round_up(n, block_n)             # no ragged last block
    if n_pad != n:
        x_flat = jnp.pad(x_flat, ((0, n_pad - n), (0, 0), (0, 0)))
    grid = (n_pad // block_n,)

    kernel = functools.partial(
        _conv2d_relu_kernel, kh=kh, kw=kw, stride=stride, dilation=dilation,
        wp=wp, h_out=h_out, w_out=w_out, n_mm=n_mm, m_pad=m_pad, block_n=block_n)

    flops = 2 * n * h_out * w_out * kh * kw * c_in * c_out
    bytes_accessed = (x_flat.size * x_flat.dtype.itemsize
                      + w2d.size * w2d.dtype.itemsize
                      + b2d.size * 4
                      + n_pad * c_out * m_pad * 4)

    out_flat = pl.pallas_call(
        kernel,
        out_shape=jax.ShapeDtypeStruct((n_pad, c_out, m_pad), jnp.float32),
        grid_spec=pltpu.PrefetchScalarGridSpec(
            num_scalar_prefetch=0,
            grid=grid,
            in_specs=[
                pl.BlockSpec((block_n, c_in_pad, l_pad), lambda g: (g, 0, 0)),
                pl.BlockSpec((c_out, k_dim), lambda g: (0, 0)),   # resident weights
                pl.BlockSpec((c_out, 1), lambda g: (0, 0)),       # resident bias
            ],
            out_specs=pl.BlockSpec((block_n, c_out, m_pad), lambda g: (g, 0, 0)),
        ),
        compiler_params=pltpu.CompilerParams(
            dimension_semantics=("parallel",),
            vmem_limit_bytes=32 * 1024 * 1024),
        cost_estimate=pl.CostEstimate(flops=flops, transcendentals=0,
                                      bytes_accessed=bytes_accessed),
    )(x_flat, w2d, b2d)

    # Strip batch / lane padding; (n, c_out, h_out*w_out) is NCHW row-major.
    return out_flat[:n, :, :m_out].reshape(n, c_out, h_out, w_out)


if __name__ == "__main__":
    # Module config: Conv2dRelu(in_ch=4, out_ch=8, kernel_size=3, stride=1,
    #                           padding=0, dilation=1, bias=True)
    in_ch, out_ch, ksize = 4, 8, 3
    key = jax.random.PRNGKey(0)
    kx, kw_, kb = jax.random.split(key, 3)

    x = jax.random.normal(kx, (2, in_ch, 16, 16), dtype=jnp.float32)          # NCHW
    fan_in = in_ch * ksize * ksize
    weight = jax.random.normal(kw_, (out_ch, in_ch, ksize, ksize),
                               dtype=jnp.float32) * (1.0 / fan_in) ** 0.5      # OIHW
    bias = jax.random.normal(kb, (out_ch,), dtype=jnp.float32) * 0.1

    def ref_conv_relu(x, w, b, stride, padding, dilation):
        y = jax.lax.conv_general_dilated(
            x, w, window_strides=(stride, stride),
            padding=[(padding, padding), (padding, padding)],
            rhs_dilation=(dilation, dilation),
            dimension_numbers=("NCHW", "OIHW", "NCHW"))
        return jnp.maximum(y + b[None, :, None, None], 0.0)

    # Default module config (f32 MXU feed -> bit-parity with the f32 reference).
    out = jax.block_until_ready(conv2d_relu(x, weight, bias,
                                            stride=1, padding=0, dilation=1))
    ref = ref_conv_relu(x, weight, bias, 1, 0, 1)
    assert out.shape == (2, out_ch, 14, 14), out.shape
    assert jnp.allclose(out, ref, atol=1e-4, rtol=1e-4), \
        float(jnp.max(jnp.abs(out - ref)))

    # Same kernel with symmetric padding=1.
    out_p = jax.block_until_ready(conv2d_relu(x, weight, bias,
                                              stride=1, padding=1, dilation=1))
    ref_p = ref_conv_relu(x, weight, bias, 1, 1, 1)
    assert out_p.shape == (2, out_ch, 16, 16), out_p.shape
    assert jnp.allclose(out_p, ref_p, atol=1e-4, rtol=1e-4), \
        float(jnp.max(jnp.abs(out_p - ref_p)))

    # bf16 MXU feed (v6e/v7x fast path), f32 accumulation + epilogue.
    out_bf = jax.block_until_ready(conv2d_relu(x, weight, bias,
                                               stride=1, padding=0, dilation=1,
                                               compute_dtype=jnp.bfloat16))
    assert out_bf.shape == (2, out_ch, 14, 14), out_bf.shape
    assert jnp.allclose(out_bf, ref, atol=6e-2, rtol=6e-2), \
        float(jnp.max(jnp.abs(out_bf - ref)))

    print("KERNEL_OK")
</pallas_src>

<mosaic_0001>
module attributes {stable_mosaic.version = 11 : i64} {
  func.func @_conv2d_relu_kernel(%arg0: i32, %arg1: memref<1x8x384xf32, #tpu.memory_space<vmem>>, %arg2: memref<8x72xf32, #tpu.memory_space<vmem>>, %arg3: memref<8x1xf32, #tpu.memory_space<vmem>>, %arg4: memref<1x8x256xf32, #tpu.memory_space<vmem>>) attributes {dimension_semantics = [#tpu.dimension_semantics<parallel>], iteration_bounds = array<i64: 2>, scalar_prefetch = 0 : i64, scratch_operands = 0 : i64, tpu.core_type = #tpu.core_type<tc>, window_params = [{transform_indices = @transform_0, window_bounds = array<i64: 1, 8, 384>}, {pipeline_mode = #tpu.pipeline_mode<synchronous>, transform_indices = @transform_1, window_bounds = array<i64: 8, 72>}, {pipeline_mode = #tpu.pipeline_mode<synchronous>, transform_indices = @transform_2, window_bounds = array<i64: 8, 1>}, {transform_indices = @transform_3, window_bounds = array<i64: 1, 8, 256>}]} {
    %c0 = arith.constant 0 : index
    %c0_0 = arith.constant 0 : index
    %0 = vector.load %arg2[%c0, %c0_0] : memref<8x72xf32, #tpu.memory_space<vmem>>, vector<8x72xf32>
    %c0_1 = arith.constant 0 : index
    %c0_2 = arith.constant 0 : index
    %c0_3 = arith.constant 0 : index
    %1 = vector.load %arg1[%c0_1, %c0_2, %c0_3] : memref<1x8x384xf32, #tpu.memory_space<vmem>>, vector<1x8x384xf32>
    %2 = vector.shape_cast %1 : vector<1x8x384xf32> to vector<8x384xf32>
    %3 = vector.extract_strided_slice %2 {offsets = [0, 0], sizes = [8, 256], strides = [1, 1]} : vector<8x384xf32> to vector<8x256xf32>
    %4 = vector.extract_strided_slice %2 {offsets = [0, 1], sizes = [8, 256], strides = [1, 1]} : vector<8x384xf32> to vector<8x256xf32>
    %5 = vector.extract_strided_slice %2 {offsets = [0, 2], sizes = [8, 256], strides = [1, 1]} : vector<8x384xf32> to vector<8x256xf32>
    %6 = vector.extract_strided_slice %2 {offsets = [0, 16], sizes = [8, 256], strides = [1, 1]} : vector<8x384xf32> to vector<8x256xf32>
    %7 = vector.extract_strided_slice %2 {offsets = [0, 17], sizes = [8, 256], strides = [1, 1]} : vector<8x384xf32> to vector<8x256xf32>
    %8 = vector.extract_strided_slice %2 {offsets = [0, 18], sizes = [8, 256], strides = [1, 1]} : vector<8x384xf32> to vector<8x256xf32>
    %9 = vector.extract_strided_slice %2 {offsets = [0, 32], sizes = [8, 256], strides = [1, 1]} : vector<8x384xf32> to vector<8x256xf32>
    %10 = vector.extract_strided_slice %2 {offsets = [0, 33], sizes = [8, 256], strides = [1, 1]} : vector<8x384xf32> to vector<8x256xf32>
    %11 = vector.extract_strided_slice %2 {offsets = [0, 34], sizes = [8, 256], strides = [1, 1]} : vector<8x384xf32> to vector<8x256xf32>
    %12 = tpu.concatenate %3, %4, %5, %6, %7, %8, %9, %10, %11 in 0 : vector<8x256xf32>, vector<8x256xf32>, vector<8x256xf32>, vector<8x256xf32>, vector<8x256xf32>, vector<8x256xf32>, vector<8x256xf32>, vector<8x256xf32>, vector<8x256xf32> -> vector<72x256xf32>
    %cst = arith.constant dense<0.000000e+00> : vector<8x256xf32>
    %13 = tpu.matmul %0, %12, %cst {dimension_numbers = #tpu.dot_dimension_numbers<[1], [0], [0], [1], [0, 0, 1, 1], [], []>} : vector<8x72xf32>, vector<72x256xf32>, vector<8x256xf32> -> vector<8x256xf32>
    %c0_4 = arith.constant 0 : index
    %c0_5 = arith.constant 0 : index
    %14 = vector.load %arg3[%c0_4, %c0_5] : memref<8x1xf32, #tpu.memory_space<vmem>>, vector<8x1xf32>
    %15 = vector.broadcast %14 : vector<8x1xf32> to vector<8x256xf32>
    %16 = arith.addf %13, %15 : vector<8x256xf32>
    %cst_6 = arith.constant 0.000000e+00 : f32
    %17 = vector.broadcast %cst_6 : f32 to vector<8x256xf32>
    %18 = arith.maximumf %16, %17 : vector<8x256xf32>
    %19 = vector.extract_strided_slice %18 {offsets = [0, 0], sizes = [8, 224], strides = [1, 1]} : vector<8x256xf32> to vector<8x224xf32>
    %20 = vector.shape_cast %19 : vector<8x224xf32> to vector<8x14x16xf32>
    %21 = vector.extract_strided_slice %20 {offsets = [0, 0, 0], sizes = [8, 14, 14], strides = [1, 1, 1]} : vector<8x14x16xf32> to vector<8x14x14xf32>
    %22 = vector.shape_cast %21 : vector<8x14x14xf32> to vector<8x196xf32>
    %cst_7 = arith.constant 0.000000e+00 : f32
    %23 = vector.broadcast %cst_7 : f32 to vector<8x60xf32>
    %24 = tpu.concatenate %22, %23 in 1 : vector<8x196xf32>, vector<8x60xf32> -> vector<8x256xf32>
    %c0_8 = arith.constant 0 : index
    %c0_9 = arith.constant 0 : index
    %c0_10 = arith.constant 0 : index
    %25 = vector.load %arg4[%c0_8, %c0_9, %c0_10] : memref<1x8x256xf32, #tpu.memory_space<vmem>>, vector<1x8x256xf32>
    %26 = vector.shape_cast %25 : vector<1x8x256xf32> to vector<8x256xf32>
    %27 = vector.shape_cast %24 : vector<8x256xf32> to vector<1x8x256xf32>
    tpu.vector_store %arg4[%c0_8, %c0_9, %c0_10], %27 {strides = array<i32>} : memref<1x8x256xf32, #tpu.memory_space<vmem>>, vector<1x8x256xf32>,
    return
  }
  func.func @transform_0(%arg0: i32) -> (i32, i32, i32) {
    %c0_i32 = arith.constant 0 : i32
    %c0_i32_0 = arith.constant 0 : i32
    %c0_i32_1 = arith.constant 0 : i32
    return %arg0, %c0_i32, %c0_i32_0 : i32, i32, i32
  }
  func.func @transform_1(%arg0: i32) -> (i32, i32) {
    %c0_i32 = arith.constant 0 : i32
    %c0_i32_0 = arith.constant 0 : i32
    %c0_i32_1 = arith.constant 0 : i32
    return %c0_i32, %c0_i32_0 : i32, i32
  }
  func.func @transform_2(%arg0: i32) -> (i32, i32) {
    %c0_i32 = arith.constant 0 : i32
    %c0_i32_0 = arith.constant 0 : i32
    %c0_i32_1 = arith.constant 0 : i32
    return %c0_i32, %c0_i32_0 : i32, i32
  }
  func.func @transform_3(%arg0: i32) -> (i32, i32, i32) {
    %c0_i32 = arith.constant 0 : i32
    %c0_i32_0 = arith.constant 0 : i32
    %c0_i32_1 = arith.constant 0 : i32
    return %arg0, %c0_i32, %c0_i32_0 : i32, i32, i32
  }
}

</mosaic_0001>

<bundles_post_ra>
// kernel: tpu_custom_call.1
= control target key start
LH: loop header
LB: loop body
LE: loop exit
PB: predicated region body
PF: predicated region fallthrough
CT: control target
= control target key end

     0   :  { %8 = vsyncpa [#allocation3], 0  ;;  %s1622_s0 = inlined_call_operand.hbm [shape: f32[2,8,384], index: 0, kind: input, shape index: {}]   ;;  %s1623_s1 = inlined_call_operand.vmem [shape: f32[8,72], index: 1, kind: input, shape index: {}]   ;;  %s1624_s2 = inlined_call_operand.vmem [shape: f32[8,1], index: 2, kind: input, shape index: {}]   ;;  %s1625_s3 = inlined_call_operand.hbm [shape: f32[2,8,256], index: 3, kind: output, shape index: {}]  }
   0x1   :  { %10 = vsyncpa [#allocation3 + $0x1], 0 }
   0x2   :  { %11 = vsyncpa [#allocation4], 0 }
   0x3   :  { %13 = vsyncpa [#allocation4 + $0x1], 0  ;;  %s1343_s12 = smov 0   ;;  %s1345_s13 = smov 0  }
   0x4   :  { %s1347_s14 = smov 0   ;;  %s1349_s15 = smov 0  }
   0x5 LB: > { %s1364_s16 = sadd.s32 4294967295, %s1291_s15   ;;  %s1092_s17 = sadd.s32 4294967294, %s1291_s15   ;;  %s1291_s15 = sphi %s1349_s15, %s1641_s15   ;;  %s1287_s14 = sphi %s1347_s14, %s1640_s14   ;;  %s1283_s13 = sphi %s1345_s13, %s1639_s13   ;;  %s1279_s12 = sphi %s1343_s12, %s1638_s12  }
   0x6   : > { %s1368_s18 = sadd.s32 1, %s1291_s15   ;;  %s26_s19 = sadd.s32 1, %s1287_s14 }
   0x7   : > { %s23_s20 = ssub.s32 %s1291_s15, %s1368_s18  ;;  %p33_p0 = scmp.ne.s32.totalorder %s1287_s14, %s1283_s13 }
   0x8   : > { %p24_p1 = scmp.eq.s32.totalorder %s23_s20, 0  ;;  %p34_p2 = scmp.eq.s32.totalorder %s1291_s15, 0 }
   0x9   : > { %p39_p3 = scmp.ne.s32.totalorder %s1283_s13, %s1279_s12  ;;  %p40_p4 = scmp.eq.s32.totalorder %s1364_s16, 0 }
   0xa   : > { %s1380_s21 = scalar_select %p24_p1, %s1287_s14, %s26_s19  }
   0xb   : > { %p35_p5 = por %p34_p2, %p33_p0  ;;  %p1382_p6 = por %p40_p4, %p39_p3 }
   0xc   : > { %p105_p7 = scmp.eq.s32.totalorder %s1364_s16, 1  ;;  %p111_p8 = scmp.eq.s32.totalorder %s1092_s17, 1 }
   0xd   : > { %s1628_s22 = scalar_select %p1382_p6, 1, 0 }
   0xe   : > { %p1136_p10 = scmp.lt.s32.totalorder %s1291_s15, 2  ;;  %p1389_p11 = por %p105_p7, %p33_p0 }
   0xf   : > { %p1393_p12 = por %p111_p8, %p39_p3  ;;  %s137_s25 = sand.u32 1, %s1287_s14  }
  0x10   : > { %s1629_s23 = scalar_select %p1389_p11, 1, 0 }
  0x11   : > { %s1630_s24 = scalar_select %p1393_p12, 1, 0 }
  0x12   : > { %s1122_s26 = smul.u32 384, %s1291_s15  ;;  %p1404_p13 = pnand %p1136_p10, %p35_p5 }
  0x13   : > { %s1121_s27 = smul.u32 24, %s137_s25  ;;  %s138_s7 = scalar_lea.sflag [#allocation3], %s137_s25 }
  0x14   : > { %s1402_s30 = scalar_lea.hbm %s1622_s0, %s1122_s26  ;;  %p1201_p3 = pneg %p1404_p13 }
  0x15   : > { %s141_s5 = scalar_lea.vmem [#allocation2], %s1121_s27  ;;  %s1199_s8 = scalar_lea.hbm %s1402_s30, 384 }
  0x16   : > { %s149_s6 = sshll.u32 %s141_s5, 4  ;;  %p1200_p2 = scmp.ne.s32.totalorder %s1402_s30, %s1199_s8  ;;  %s150_s6 = int_to_ptr.vmem [resolvable:$true] %s149_s6 }
  0x17   : > { %s1204_s11 = scalar_lea.hbm %s1622_s0, 768  ;;  %p1205_p5 = scmp.lt.s32.totalorder %s1402_s30, %s1622_s0 }
  0x18   : > { %p1202_p4 = pnand %p1201_p3, %p1200_p2  ;;  %p1206_p8 = scmp.lt.s32.totalorder %s1204_s11, %s1199_s8 }
  0x1a   : > { %p1203_p7 = pneg %p1202_p4  ;;  %p1207_p10 = por %p1206_p8, %p1205_p5 }
  0x1c   : > { %p1208_p9 = pnand %p1207_p10, %p1203_p7 }
  0x1e   : > { %1211 = shalt.err (!%p1208_p9)
}
  0x1f   : > { %s1212_s20 = scalar_lea.vmem %s150_s6, 384  ;;  %s1293_s25 = smov [#allocation2]  }
  0x20   : > { %p1213_p0 = scmp.ne.s32.totalorder %s150_s6, %s1212_s20  ;;  %s1217_s26 = sshll.u32 %s1293_s25, 4  ;;  %s1218_s26 = int_to_ptr.vmem [resolvable:$false] %s1217_s26 }
  0x21   : > { %s1219_s27 = scalar_lea.vmem %s1218_s26, 768  ;;  %p1220_p2 = scmp.lt.s32.totalorder %s150_s6, %s1218_s26 }
  0x22   : > { %p1215_p1 = pnand %p1213_p0, %p1201_p3  ;;  %p1221_p4 = scmp.lt.s32.totalorder %s1219_s27, %s1212_s20 }
  0x24   : > { %p1216_p12 = pneg %p1215_p1  ;;  %p1222_p11 = por %p1221_p4, %p1220_p2 }
  0x26   : > { %p1223_p6 = pnand %p1222_p11, %p1216_p12 }
  0x28   : > { %1226 = shalt.err (!%p1223_p6)
}
  0x29   : > { %1131 = dma.hbm_to_vmem [thread:$0]  (!%p1404_p13), %s1402_s30, 384, %s150_s6, %s138_s7  }
  0x2a   : > { %p1632_p9 = scmp.lt.s32.totalorder %s1291_s15, 3  ;;  %p1633_p7 = scmp.ge.s32.totalorder %s1291_s15, 1 }
  0x2c   : > { %p155_p5 = pnand %p1633_p7, %p1632_p9 }
  0x2d   : > { %s1429_s28 = sand.u32 (!%p155_p5), 1, %s1283_s13   ;;  %p1634_p6 = scmp.ne.s32.totalorder (!%p155_p5), %s1628_s22, 0 }
  0x2e   : > { %158 = sbr.rel (%p155_p5) target bundleno = 713 (0x2c9), region = 32  ;;  %s161_s5 = scalar_lea.sflag (!%p155_p5), [#allocation3], %s1429_s28 }
  0x2f   : > { %s1123_s29 = smul.u32 (!%p155_p5), 24, %s1429_s28 }
  0x31   : > { %s164_s8 = scalar_lea.vmem (!%p155_p5), [#allocation2], %s1123_s29 }
  0x33   : > { %1270 = dma.done.wait (%p1634_p6), %s161_s5, 384  }
  0x34   : > { %1272 = vsyncadd (%p1634_p6), %s161_s5, 4294966912  ;;  %v1437_v0 = vld [vmem:[%s164_s8 + $0x8] sm:$0xff]  ;;  %v1439_v1 = vld [vmem:[%s164_s8] sm:$0xff]  ;;  %s1294_s30 = smov 94   ;;  %s1295_s4 = smov 95   ;;  %v1300_v3 = vmov 0.0   ;;  %v408_v56 = vlaneseq }
  0x35   : > { %273 = vrot.lane.b32.xlu0 %v1437_v0, %s1294_s30  ;;  %271 = vrot.lane.b32.xlu1 %v1439_v1, %s1294_s30  ;;  %v190_v2 = vld [vmem:[%s164_s8 + $0x10] sm:$0xff]  ;;  %s1296_s6 = smov 96   ;;  %s1297_s22 = smov 110   ;;  %v1302_v4 = vmov 0   ;;  %v282_v5 = vld [vmem:[%s1624_s2] sm:$0xff]  ;;  %vm277_vm0 = vcmask 769024  }
  0x36   : > { %s1298_s7 = smov 111   ;;  %s1299_s9 = smov 112   ;;  %356 = vmatprep.mubr.f32.mxu0 %v1300_v3  ;;  %1198 = vset.pattern.permute.xlu0 %v1302_v4  ;;  %vm266_vm1 = vcmask 777216   ;;  %vm255_vm2 = vcmask 785408   ;;  %vm244_vm3 = vcmask 900096   ;;  %vm233_vm4 = vcmask 908288  }
  0x37   : > { %s1301_s10 = smov 126   ;;  %s1303_s11 = smov 127   ;;  %vm222_vm5 = vcmask 916480   ;;  %vm211_vm6 = vcmask 1031168   ;;  %vm200_vm7 = vcmask 1039360   ;;  %v187_v46 = vld [vmem:[%s1623_s1] sm:$0xff] }
  0x38   : > { %vm288_vm8 = vcmask 588800   ;;  %s1304_s26 = smov 80   ;;  %s1305_s27 = smov 48   ;;  %v1309_v54 = vmov 1983009808   ;;  %v409_v60 = vshrl.u32 %v408_v56, 7 }
  0x39   : > { %275 = vrot.lane.b32.xlu0 %v190_v2, %s1294_s30  ;;  %262 = vrot.lane.b32.xlu1 %v1437_v0, %s1295_s4  ;;  %s1306_s29 = smov 16   ;;  %s1307_s5 = smov 64   ;;  %v406_v55 = vunpack.c.l.s4 %v1309_v54  ;;  %v1310_v57 = vmov 1934713408   ;;  %vm979_vm9 = vcmask 113664   ;;  %vm981_vm10 = vcmask 228352  }
  0x3a   : > { %s1308_s8 = smov 32   ;;  %v470_v58 = vunpack.c.l.s4 %v1310_v57  ;;  %s1311_s30 = smov 28   ;;  %vm983_vm11 = vcmask 343040   ;;  %vm985_vm12 = vcmask 457728   ;;  %vm987_vm13 = vcmask 572416  }
  0x3b   : > { %v407_v59 = vunpack.c.0.s8 %v406_v55  ;;  %s1317_s17 = smov 12   ;;  %s1318_s19 = smov 98   ;;  %vm989_vm14 = vcmask 687104   ;;  %vm995_vm15 = vcmask 97280  }
  0x3c   : > { %v471_v63 = vunpack.c.0.s8 %v470_v58  ;;  %s1319_s20 = smov 26   ;;  %s1320_s25 = smov 40  }
  0x3d   : > { %264 = vrot.lane.b32.xlu0 %v190_v2, %s1295_s4  ;;  %260 = vrot.lane.b32.xlu1 %v1439_v1, %s1295_s4  ;;  %s1312_s4 = smov 14   ;;  %p1635_p12 = scmp.ne.s32.totalorder %s1629_s23, 0 }
  0x41   : > { %251 = vrot.lane.b32.xlu0 %v1437_v0, %s1296_s6  ;;  %253 = vrot.lane.b32.xlu1 %v190_v2, %s1296_s6 }
  0x45   : > { %249 = vrot.lane.b32.xlu0 %v1439_v1, %s1296_s6  ;;  %240 = vrot.lane.b32.xlu1 %v1437_v0, %s1297_s22 }
  0x49   : > { %242 = vrot.lane.b32.xlu0 %v190_v2, %s1297_s22  ;;  %238 = vrot.lane.b32.xlu1 %v1439_v1, %s1297_s22  ;;  %s1314_s22 = smov 56  }
  0x4d   : > { %229 = vrot.lane.b32.xlu0 %v1437_v0, %s1298_s7  ;;  %231 = vrot.lane.b32.xlu1 %v190_v2, %s1298_s7 }
  0x51   : > { %227 = vrot.lane.b32.xlu0 %v1439_v1, %s1298_s7  ;;  %218 = vrot.lane.b32.xlu1 %v1437_v0, %s1299_s9  ;;  %s1315_s7 = smov 70  }
  0x55   : > { %220 = vrot.lane.b32.xlu0 %v190_v2, %s1299_s9  ;;  %216 = vrot.lane.b32.xlu1 %v1439_v1, %s1299_s9 }
  0x59   : > { %207 = vrot.lane.b32.xlu0 %v1437_v0, %s1301_s10  ;;  %209 = vrot.lane.b32.xlu1 %v190_v2, %s1301_s10 }
  0x5d   : > { %205 = vrot.lane.b32.xlu0 %v1439_v1, %s1301_s10  ;;  %196 = vrot.lane.b32.xlu1 %v1437_v0, %s1303_s11 }
  0x61   : > { %198 = vrot.lane.b32.xlu0 %v190_v2, %s1303_s11  ;;  %194 = vrot.lane.b32.xlu1 %v1439_v1, %s1303_s11  ;;  %s1316_s11 = smov 84  }
  0x65   : > { %285 = vperm.xlu0 %1198, %v282_v5  }
  0xa7   : > { %v274_v6 = vpop.permute.xlu0 %273  ;;  %v272_v7 = vpop.permute.xlu1 %271 }
  0xa8   : > { %v278_v11 = vsel %vm277_vm0, %v272_v7, %v274_v6 }
  0xab   : > { %v276_v8 = vpop.permute.xlu0 %275  ;;  %v263_v9 = vpop.permute.xlu1 %262 }
  0xac   : > { %v279_v10 = vsel %vm277_vm0, %v274_v6, %v276_v8  ;;  %v1492_v8 = vsub.s32 %v471_v63, %v409_v60  ;;  %vm991_vm0 = vcmask 801792  }
  0xad   : > { %306 = vmatprep.subr.mxu0 %v279_v10 }
  0xae   : > { %307 = vmatpush1.msra.mxu0 %v278_v11 }
  0xaf   : > { %v265_v12 = vpop.permute.xlu0 %264  ;;  %v261_v13 = vpop.permute.xlu1 %260 }
  0xb0   : > { %v268_v14 = vsel %vm266_vm1, %v263_v9, %v265_v12  ;;  %v267_v15 = vsel %vm266_vm1, %v261_v13, %v263_v9  ;;  %vm997_vm1 = vcmask 211968  }
  0xb1   : > { %308 = vmatprep.subr.mxu0 %v268_v14 }
  0xb2   : > { %309 = vmatpush1.msra.mxu0 %v267_v15 }
  0xb3   : > { %v252_v16 = vpop.permute.xlu0 %251  ;;  %v254_v17 = vpop.permute.xlu1 %253 }
  0xb4   : > { %v257_v18 = vsel %vm255_vm2, %v252_v16, %v254_v17 }
  0xb5   : > { %310 = vmatprep.subr.mxu0 %v257_v18 }
  0xb7   : > { %v250_v19 = vpop.permute.xlu0 %249  ;;  %v241_v20 = vpop.permute.xlu1 %240 }
  0xb8   : > { %v256_v21 = vsel %vm255_vm2, %v250_v19, %v252_v16  ;;  %vm999_vm2 = vcmask 326656  }
  0xb9   : > { %311 = vmatpush1.msra.mxu0 %v256_v21 }
  0xbb   : > { %v243_v22 = vpop.permute.xlu0 %242  ;;  %v239_v23 = vpop.permute.xlu1 %238 }
  0xbc   : > { %v246_v24 = vsel %vm244_vm3, %v241_v20, %v243_v22  ;;  %v245_v25 = vsel %vm244_vm3, %v239_v23, %v241_v20  ;;  %vm1001_vm3 = vcmask 441344  }
  0xbd   : > { %312 = vmatprep.subr.mxu0 %v246_v24 }
  0xbe   : > { %313 = vmatpush1.msra.mxu0 %v245_v25 }
  0xbf   : > { %v230_v26 = vpop.permute.xlu0 %229  ;;  %v232_v27 = vpop.permute.xlu1 %231 }
  0xc0   : > { %v235_v28 = vsel %vm233_vm4, %v230_v26, %v232_v27 }
  0xc1   : > { %314 = vmatprep.subr.mxu0 %v235_v28 }
  0xc3   : > { %v228_v29 = vpop.permute.xlu0 %227  ;;  %v219_v30 = vpop.permute.xlu1 %218 }
  0xc4   : > { %v234_v31 = vsel %vm233_vm4, %v228_v29, %v230_v26  ;;  %vm1003_vm4 = vcmask 556032  }
  0xc5   : > { %315 = vmatpush1.msra.mxu0 %v234_v31 }
  0xc7   : > { %v221_v32 = vpop.permute.xlu0 %220  ;;  %v217_v33 = vpop.permute.xlu1 %216 }
  0xc8   : > { %v224_v34 = vsel %vm222_vm5, %v219_v30, %v221_v32  ;;  %v223_v35 = vsel %vm222_vm5, %v217_v33, %v219_v30 }
  0xc9   : > { %316 = vmatprep.subr.mxu0 %v224_v34 }
  0xca   : > { %317 = vmatpush1.msra.mxu0 %v223_v35 }
  0xcb   : > { %v208_v36 = vpop.permute.xlu0 %207  ;;  %v210_v37 = vpop.permute.xlu1 %209 }
  0xcc   : > { %v213_v38 = vsel %vm211_vm6, %v208_v36, %v210_v37 }
  0xcd   : > { %318 = vmatprep.subr.mxu0 %v213_v38 }
  0xcf   : > { %v206_v39 = vpop.permute.xlu0 %205  ;;  %v197_v40 = vpop.permute.xlu1 %196 }
  0xd0   : > { %v212_v41 = vsel %vm211_vm6, %v206_v39, %v208_v36 }
  0xd1   : > { %319 = vmatpush1.msra.mxu0 %v212_v41 }
  0xd3   : > { %v199_v42 = vpop.permute.xlu0 %198  ;;  %v195_v43 = vpop.permute.xlu1 %194 }
  0xd4   : > { %v202_v44 = vsel %vm200_vm7, %v197_v40, %v199_v42  ;;  %v201_v45 = vsel %vm200_vm7, %v195_v43, %v197_v40 }
  0xd5   : > { %320 = vmatprep.subr.mxu0 %v202_v44 }
  0xd6   : > { %321 = vmatpush1.msra.mxu0 %v201_v45 }
  0xd7   : > { %322 = vmatprep.subr.mxu0 %v1437_v0  ;;  %v1490_v0 = vsub.s32 %v407_v59, %v409_v60 }
  0xd8   : > { %323 = vmatpush1.msra.mxu0 %v1439_v1 }
  0xd9   : > { %1098 = vmatmul.mubr.msk.f32.vlgmr.msra.gmra.mxu0 %vm288_vm8, %v187_v46 }
  0xe0   : > { %v286_v47 = vpop.permute.xlu0 %285 }
 0x199   : > { %v358_v48 = vpop.f32.mrf.mxu0 }
 0x19a   : > { %v359_v49 = vadd.f32 %v358_v48, %v286_v47 }
 0x19b   : > { %v360_v51 = vpop.f32.mrf.mxu0 }
 0x19c   : > { %v363_v50 = vmax.f32 %v359_v49, 0.0  ;;  %v361_v52 = vadd.f32 %v360_v51, %v286_v47 }
 0x19e   : > { %372 = vrot.lane.b32.xlu0 %v363_v50, %s1304_s26  ;;  %366 = vrot.lane.b32.xlu1 %v363_v50, %s1299_s9  ;;  %v1481_v53 = vmax.f32 %v361_v52, 0.0 }
 0x1a2   : > { %378 = vrot.lane.b32.xlu0 %v363_v50, %s1305_s27  ;;  %369 = vrot.lane.b32.xlu1 %v363_v50, %s1296_s6 }
 0x1a6   : > { %384 = vrot.lane.b32.xlu0 %v363_v50, %s1306_s29  ;;  %375 = vrot.lane.b32.xlu1 %v363_v50, %s1307_s5 }
 0x1aa   : > { %391 = vrot.lane.b32.xlu0 %v1481_v53, %s1296_s6  ;;  %381 = vrot.lane.b32.xlu1 %v363_v50, %s1308_s8  ;;  %s1313_s6 = smov 42  }
 0x1ae   : > { %397 = vrot.lane.b32.xlu0 %v1481_v53, %s1307_s5  ;;  %388 = vrot.lane.b32.xlu1 %v1481_v53, %s1299_s9 }
 0x1b2   : > { %394 = vrot.lane.b32.xlu1 %v1481_v53, %s1304_s26  ;;  %s1321_s26 = smov 54  }
 0x1b6   : > { %400 = vrot.lane.b32.xlu1 %v1481_v53, %s1305_s27 }
 0x210   : > { %v373_v61 = vpop.permute.xlu0 %372  ;;  %v367_v62 = vpop.permute.xlu1 %366 }
 0x211   : > { %v419_v1 = vcombine.low %v367_v62, %v373_v61  ;;  %v420_v2 = vcombine.high %v367_v62, %v373_v61 }
 0x213   : > { %v427_v9 = vrot.slane %v419_v1, %v1490_v0  ;;  %v434_v10 = vrot.slane %v420_v2, %v1490_v0 }
 0x214   : > { %v379_v4 = vpop.permute.xlu0 %378  ;;  %v370_v5 = vpop.permute.xlu1 %369 }
 0x215   : > { %v403_v6 = vcombine.low %v363_v50, %v370_v5  ;;  %v404_v7 = vcombine.high %v363_v50, %v370_v5 }
 0x217   : > { %v411_v11 = vrot.slane %v403_v6, %v1490_v0  ;;  %v418_v12 = vrot.slane %v404_v7, %v1490_v0 }
 0x218   : > { %v385_v13 = vpop.permute.xlu0 %384  ;;  %v376_v14 = vpop.permute.xlu1 %375 }
 0x219   : > { %v467_v15 = vcombine.low %v411_v11, %v427_v9  ;;  %v468_v16 = vcombine.high %v411_v11, %v427_v9  ;;  %v483_v17 = vcombine.low %v418_v12, %v434_v10  ;;  %v484_v18 = vcombine.high %v418_v12, %v434_v10 }
 0x21a   : > { %v451_v19 = vcombine.low %v379_v4, %v385_v13  ;;  %v452_v24 = vcombine.high %v379_v4, %v385_v13 }
 0x21b   : > { %v475_v20 = vrot.slane %v467_v15, %v1492_v8  ;;  %v482_v21 = vrot.slane %v468_v16, %v1492_v8  ;;  %v491_v22 = vrot.slane %v483_v17, %v1492_v8  ;;  %v498_v23 = vrot.slane %v484_v18, %v1492_v8 }
 0x21c   : > { %v459_v25 = vrot.slane %v451_v19, %v1490_v0  ;;  %v392_v26 = vpop.permute.xlu0 %391  ;;  %v382_v27 = vpop.permute.xlu1 %381  ;;  %v466_v40 = vrot.slane %v452_v24, %v1490_v0 }
 0x21d   : > { %v1099_v28 = vcombine.low %v475_v20, %v482_v21  ;;  %v1101_v29 = vcombine.high %v475_v20, %v482_v21  ;;  %v1103_v30 = vcombine.low %v491_v22, %v498_v23  ;;  %v1105_v31 = vcombine.high %v491_v22, %v498_v23 }
 0x21e   : > { %v539_v32 = vcombine.low %v1481_v53, %v392_v26  ;;  %v540_v33 = vcombine.high %v1481_v53, %v392_v26  ;;  %v435_v34 = vcombine.low %v376_v14, %v382_v27  ;;  %v436_v35 = vcombine.high %v376_v14, %v382_v27 }
 0x21f   : > { %v681_v36 = vrot.slane %v1099_v28, %v1490_v0  ;;  %v697_v37 = vrot.slane %v1101_v29, %v1490_v0  ;;  %v713_v38 = vrot.slane %v1103_v30, %v1490_v0  ;;  %v729_v39 = vrot.slane %v1105_v31, %v1490_v0 }
 0x220   : > { %v547_v41 = vrot.slane %v539_v32, %v1490_v0  ;;  %v443_v42 = vrot.slane %v435_v34, %v1490_v0  ;;  %v450_v43 = vrot.slane %v436_v35, %v1490_v0  ;;  %v398_v44 = vpop.permute.xlu0 %397  ;;  %v389_v45 = vpop.permute.xlu1 %388  ;;  %v554_v46 = vrot.slane %v540_v33, %v1490_v0 }
 0x221   : > { %v571_v47 = vcombine.high %v398_v44, %v1300_v3  ;;  %v738_v48 = vcombine.high %v681_v36, %v697_v37  ;;  %v770_v49 = vcombine.high %v713_v38, %v729_v39  ;;  %v578_v54 = vrot.slane %v398_v44, %v1490_v0 }
 0x222   : > { %v499_v50 = vcombine.low %v443_v42, %v459_v25  ;;  %v500_v51 = vcombine.high %v443_v42, %v459_v25  ;;  %v515_v52 = vcombine.low %v450_v43, %v466_v40  ;;  %v516_v53 = vcombine.high %v450_v43, %v466_v40 }
 0x223   : > { %v1517_v55 = vrot.slane %v738_v48, %v1492_v8  ;;  %v1520_v56 = vrot.slane %v770_v49, %v1492_v8  ;;  %v737_v57 = vcombine.low %v681_v36, %v697_v37  ;;  %v585_v63 = vrot.slane %v571_v47, %v1490_v0 }
 0x224   : > { %v507_v58 = vrot.slane %v499_v50, %v1492_v8  ;;  %v514_v59 = vrot.slane %v500_v51, %v1492_v8  ;;  %v523_v60 = vrot.slane %v515_v52, %v1492_v8  ;;  %v530_v61 = vrot.slane %v516_v53, %v1492_v8  ;;  %v395_v62 = vpop.permute.xlu1 %394 }
 0x225   : > { %v555_v1 = vcombine.low %v389_v45, %v395_v62  ;;  %v556_v2 = vcombine.high %v389_v45, %v395_v62  ;;  %v803_v4 = vcombine.low %v1517_v55, %v1520_v56  ;;  %v1532_v12 = vrot.slane %v737_v57, %v1492_v8 }
 0x226   : > { %v1100_v5 = vcombine.low %v507_v58, %v514_v59  ;;  %v1102_v6 = vcombine.high %v507_v58, %v514_v59  ;;  %v1104_v7 = vcombine.low %v523_v60, %v530_v61  ;;  %v1106_v9 = vcombine.high %v523_v60, %v530_v61 }
 0x227   : > { %v563_v10 = vrot.slane %v555_v1, %v1490_v0  ;;  %v570_v11 = vrot.slane %v556_v2, %v1490_v0  ;;  %932 = vrot.lane.b32.xlu1 %v803_v4, %s1311_s30  ;;  %v769_v13 = vcombine.low %v713_v38, %v729_v39  ;;  %v804_v36 = vcombine.high %v1517_v55, %v1520_v56 }
 0x228   : > { %v401_v14 = vpop.permute.xlu1 %400  ;;  %v688_v15 = vrot.slane %v1100_v5, %v1490_v0  ;;  %v704_v16 = vrot.slane %v1102_v6, %v1490_v0  ;;  %v720_v17 = vrot.slane %v1104_v7, %v1490_v0  ;;  %v736_v18 = vrot.slane %v1106_v9, %v1490_v0 }
 0x229   : > { %v601_v19 = vcombine.low %v547_v41, %v563_v10  ;;  %v602_v20 = vcombine.high %v547_v41, %v563_v10  ;;  %v617_v21 = vcombine.low %v554_v46, %v570_v11  ;;  %v618_v22 = vcombine.high %v554_v46, %v570_v11 }
 0x22a   : > { %v1539_v23 = vrot.slane %v769_v13, %v1492_v8  ;;  %v586_v24 = vcombine.high %v401_v14, %v1300_v3  ;;  %v593_v25 = vrot.slane %v401_v14, %v1490_v0  ;;  %v753_v26 = vcombine.low %v688_v15, %v704_v16 }
 0x22b   : > { %v609_v27 = vrot.slane %v601_v19, %v1492_v8  ;;  %v616_v28 = vrot.slane %v602_v20, %v1492_v8  ;;  %v625_v29 = vrot.slane %v617_v21, %v1492_v8  ;;  %v632_v30 = vrot.slane %v618_v22, %v1492_v8 }
 0x22c   : > { %v802_v31 = vcombine.high %v1532_v12, %v1539_v23  ;;  %v600_v32 = vrot.slane %v586_v24, %v1490_v0  ;;  %v633_v33 = vcombine.low %v578_v54, %v593_v25  ;;  %v634_v34 = vcombine.high %v578_v54, %v593_v25 }
 0x22d   : > { %v1107_v35 = vcombine.low %v609_v27, %v616_v28  ;;  %v1109_v3 = vcombine.high %v609_v27, %v616_v28  ;;  %v761_v41 = vrot.slane %v753_v26, %v1492_v8  ;;  %v785_v42 = vcombine.low %v720_v17, %v736_v18 }
 0x22e   : > { %928 = vrot.lane.b32.xlu0 %v802_v31, %s1312_s4  ;;  %v641_v37 = vrot.slane %v633_v33, %v1492_v8  ;;  %v648_v38 = vrot.slane %v634_v34, %v1492_v8  ;;  %v649_v39 = vcombine.low %v585_v63, %v600_v32  ;;  %v650_v40 = vcombine.high %v585_v63, %v600_v32 }
 0x22f   : > { %v754_v43 = vcombine.high %v688_v15, %v704_v16  ;;  %v786_v44 = vcombine.high %v720_v17, %v736_v18  ;;  %v1111_v45 = vcombine.low %v625_v29, %v632_v30  ;;  %v1113_v46 = vcombine.high %v625_v29, %v632_v30 }
 0x230   : > { %v657_v47 = vrot.slane %v649_v39, %v1492_v8  ;;  %v664_v48 = vrot.slane %v650_v40, %v1492_v8  ;;  %v793_v49 = vrot.slane %v785_v42, %v1492_v8  ;;  %v1108_v50 = vcombine.low %v641_v37, %v648_v38 }
 0x231   : > { %v817_v53 = vrot.slane %v1107_v35, %v1490_v0  ;;  %v768_v56 = vrot.slane %v754_v43, %v1492_v8  ;;  %v800_v57 = vrot.slane %v786_v44, %v1492_v8  ;;  %v1110_v58 = vcombine.high %v641_v37, %v648_v38 }
 0x232   : > { %v1112_v51 = vcombine.low %v657_v47, %v664_v48  ;;  %v1114_v52 = vcombine.high %v657_v47, %v664_v48  ;;  %936 = vrot.lane.b32.xlu0 %v804_v36, %s1313_s6  ;;  %v806_v54 = vcombine.high %v761_v41, %v793_v49  ;;  %v805_v55 = vcombine.low %v761_v41, %v793_v49  ;;  %s1322_s6 = smov [#allocation5]  }
 0x233   : > { %v833_v59 = vrot.slane %v1109_v3, %v1490_v0  ;;  %v849_v60 = vrot.slane %v1111_v45, %v1490_v0  ;;  %v865_v61 = vrot.slane %v1113_v46, %v1490_v0  ;;  %v801_v62 = vcombine.low %v1532_v12, %v1539_v23 }
 0x234   : > { %940 = vrot.lane.b32.xlu1 %v805_v55, %s1314_s22  ;;  %v856_v2 = vrot.slane %v1112_v51, %v1490_v0  ;;  %v872_v4 = vrot.slane %v1114_v52, %v1490_v0  ;;  %v807_v5 = vcombine.low %v768_v56, %v800_v57  ;;  %v824_v9 = vrot.slane %v1108_v50, %v1490_v0  ;;  %s1231_s22 = sshll.u32 %s1322_s6, 4  ;;  %s1232_s22 = int_to_ptr.vmem [resolvable:$false] %s1231_s22 }
 0x235   : > { %v874_v63 = vcombine.high %v817_v53, %v833_v59  ;;  %v898_v1 = vcombine.high %v849_v60, %v865_v61  ;;  %v873_v6 = vcombine.low %v817_v53, %v833_v59  ;;  %v897_v7 = vcombine.low %v849_v60, %v865_v61 }
 0x236   : > { %944 = vrot.lane.b32.xlu0 %v806_v54, %s1315_s7  ;;  %v840_v10 = vrot.slane %v1110_v58, %v1490_v0  ;;  %v913_v14 = vcombine.low %v856_v2, %v872_v4  ;;  %v808_v15 = vcombine.high %v768_v56, %v800_v57  ;;  %s1233_s7 = scalar_lea.vmem %s1232_s22, 512 }
 0x237   : > { %v888_v11 = vrot.slane %v874_v63, %v1492_v8  ;;  %v912_v13 = vrot.slane %v898_v1, %v1492_v8  ;;  %v881_v16 = vrot.slane %v873_v6, %v1492_v8  ;;  %v905_v17 = vrot.slane %v897_v7, %v1492_v8 }
 0x238   : > { %948 = vrot.lane.b32.xlu1 %v807_v5, %s1316_s11  ;;  %v889_v18 = vcombine.low %v824_v9, %v840_v10  ;;  %v920_v0 = vrot.slane %v913_v14, %v1492_v8 }
 0x239   : > { %v923_v12 = vcombine.low %v888_v11, %v912_v13  ;;  %v924_v19 = vcombine.high %v888_v11, %v912_v13  ;;  %v922_v20 = vcombine.high %v881_v16, %v905_v17  ;;  %v921_v23 = vcombine.low %v881_v16, %v905_v17 }
 0x23a   : > { %v896_v21 = vrot.slane %v889_v18, %v1492_v8 }
 0x23b   : > { %964 = vrot.lane.b32.xlu0 %v923_v12, %s1317_s17 }
 0x23c   : > { %952 = vrot.lane.b32.xlu1 %v808_v15, %s1318_s19  ;;  %v925_v22 = vcombine.low %v896_v21, %v920_v0  ;;  %v926_v24 = vcombine.high %v896_v21, %v920_v0 }
 0x23f   : > { %968 = vrot.lane.b32.xlu0 %v924_v19, %s1319_s20 }
 0x240   : > { %960 = vrot.lane.b32.xlu1 %v922_v20, %s1301_s10  ;;  %s1120_s10 = sshll.u32 %s1364_s16, 8  ;;  %s1008_s16 = scalar_lea.sflag [#allocation4], %s1429_s28 }
 0x241   : > { %s1585_s30 = scalar_lea.hbm %s1625_s3, %s1120_s10 }
 0x243   : > { %972 = vrot.lane.b32.xlu0 %v925_v22, %s1320_s25 }
 0x244   : > { %956 = vrot.lane.b32.xlu1 %v921_v23, %s1299_s9  ;;  %s1097_s9 = sshll.u32 %s1429_s28, 4 }
 0x245   : > { %s186_s27 = scalar_lea.vmem [#allocation5], %s1097_s9 }
 0x246   : > { %s1022_s29 = sshll.u32 %s186_s27, 4  ;;  %s1023_s29 = int_to_ptr.vmem [resolvable:$true] %s1022_s29 }
 0x247   : > { %976 = vrot.lane.b32.xlu0 %v926_v24, %s1321_s26  ;;  %s1227_s4 = scalar_lea.vmem %s1023_s29, 256  ;;  %p1234_p1 = scmp.lt.s32.totalorder %s1023_s29, %s1232_s22 }
 0x248   : > { %p1228_p11 = scmp.ne.s32.totalorder %s1023_s29, %s1227_s4  ;;  %p1235_p3 = scmp.lt.s32.totalorder %s1233_s7, %s1227_s4 }
 0x24a   : > { %p1229_p13 = pnand %p1228_p11, %p1635_p12  ;;  %p1236_p8 = por %p1235_p3, %p1234_p1 }
 0x24c   : > { %p1230_p0 = pneg %p1229_p13 }
 0x24e   : > { %p1237_p10 = pnand %p1236_p8, %p1230_p0 }
 0x299   : > { %v933_v26 = vpop.permute.xlu1 %932 }
 0x2a0   : > { %v929_v25 = vpop.permute.xlu0 %928 }
 0x2a1   : > { %v980_v8 = vsel %vm979_vm9, %v801_v62, %v929_v25 }
 0x2a2   : > { %v982_v33 = vsel %vm981_vm10, %v980_v8, %v933_v26 }
 0x2a4   : > { %v937_v27 = vpop.permute.xlu0 %936 }
 0x2a5   : > { %v984_v34 = vsel %vm983_vm11, %v982_v33, %v937_v27 }
 0x2a6   : > { %v941_v28 = vpop.permute.xlu1 %940 }
 0x2a7   : > { %v986_v35 = vsel %vm985_vm12, %v984_v34, %v941_v28 }
 0x2a8   : > { %v945_v29 = vpop.permute.xlu0 %944 }
 0x2a9   : > { %v988_v37 = vsel %vm987_vm13, %v986_v35, %v945_v29 }
 0x2aa   : > { %v949_v30 = vpop.permute.xlu1 %948 }
 0x2ab   : > { %v990_v38 = vsel %vm989_vm14, %v988_v37, %v949_v30 }
 0x2ad   : > { %v965_v31 = vpop.permute.xlu0 %964 }
 0x2ae   : > { %v953_v32 = vpop.permute.xlu1 %952 }
 0x2af   : > { %v992_v41 = vsel %vm991_vm0, %v990_v38, %v953_v32 }
 0x2b1   : > { %v969_v3 = vpop.permute.xlu0 %968 }
 0x2b2   : > { %v961_v36 = vpop.permute.xlu1 %960 }
 0x2b3   : > { %v996_v39 = vsel %vm995_vm15, %v961_v36, %v965_v31 }
 0x2b4   : > { %v998_v44 = vsel %vm997_vm1, %v996_v39, %v969_v3 }
 0x2b5   : > { %v973_v40 = vpop.permute.xlu0 %972 }
 0x2b6   : > { %v957_v42 = vpop.permute.xlu1 %956  ;;  %v1000_v46 = vsel %vm999_vm2, %v998_v44, %v973_v40 }
 0x2b7   : > { %v993_v43 = vsel %vm222_vm5, %v992_v41, %v957_v42 }
 0x2b8   : > { %v994_v45 = vsel %vm211_vm6, %v993_v43, %v961_v36 }
 0x2b9   : > { %1005 = vst [vmem:[%s186_s27] sm:$0xff] %v994_v45  ;;  %v977_v47 = vpop.permute.xlu0 %976 }
 0x2ba   : > { %v1002_v48 = vsel %vm1001_vm3, %v1000_v46, %v977_v47 }
 0x2bb   : > { %v1004_v49 = vsel %vm1003_vm4, %v1002_v48, 0.0 }
 0x2bc   : > { %1006 = vst [vmem:[%s186_s27 + $0x8] sm:$0xff] %v1004_v49 }
 0x2bd   : > { %1240 = shalt.err (!%p1237_p10)
}
 0x2be   : > { %s1241_s11 = scalar_lea.hbm %s1585_s30, 256  ;;  %s1245_s19 = scalar_lea.hbm %s1625_s3, 512 }
 0x2bf   : > { %p1242_p2 = scmp.ne.s32.totalorder %s1585_s30, %s1241_s11  ;;  %p1246_p7 = scmp.lt.s32.totalorder %s1585_s30, %s1625_s3 }
 0x2c0   : > { %p1247_p5 = scmp.lt.s32.totalorder %s1245_s19, %s1241_s11 }
 0x2c1   : > { %p1243_p4 = pnand %p1242_p2, %p1635_p12 }
 0x2c2   : > { %p1248_p6 = por %p1247_p5, %p1246_p7 }
 0x2c3   : > { %p1244_p9 = pneg %p1243_p4 }
 0x2c5   : > { %p1249_p11 = pnand %p1248_p6, %p1244_p9 }
 0x2c7   : > { %1252 = shalt.err (!%p1249_p11)
}
 0x2c8   : > { %1126 = dma.vmem_to_hbm [thread:$0]  (%p1635_p12), %s1023_s29, 256, %s1585_s30, %s1008_s16  }
 0x2c9 PF: > { %s1034_s26 = sand.u32 1, %s1279_s12   ;;  %p1636_p13 = scmp.ne.s32.totalorder %s1630_s24, 0 }
 0x2ca   : > { %p1637_p0 = scmp.ge.s32.totalorder %s1291_s15, 2  ;;  %s1035_s9 = scalar_lea.sflag [#allocation4], %s1034_s26 }
 0x2cc   : > { %p1133_p1 = pnand %p1637_p0, %p1636_p13 }
 0x2ce   : > { %p1134_p3 = pneg %p1133_p1 }
 0x2d0   : > { %1274 = dma.done.wait (%p1134_p3), %s1035_s9, 256  }
 0x2d1   : > { %1276 = vsyncadd (%p1134_p3), %s1035_s9, 4294967040  ;;  %p16_p8 = scmp.ge.s32.totalorder %s1368_s18, 4   ;;  %s1638_s12 = smov %s1283_s13 }
 0x2d2   : > { %s1639_s13 = smov %s1287_s14  ;;  %s1640_s14 = smov %s1380_s21 }
 0x2d3   : > { %s1641_s15 = smov %s1368_s18  ;;  %18 = sbr.rel (!%p16_p8) target bundleno = 5 (0x5), region = 77 }
 0x2d8   :  { %1040 = vsyncpa [#allocation3], 1 }
 0x2d9   :  { %1042 = vsyncpa [#allocation3 + $0x1], 1 }
 0x2da   :  { %1043 = vsyncpa [#allocation4], 1 }
 0x2db   :  { %1045 = vsyncpa [#allocation4 + $0x1], 1 }

</bundles_post_ra>
